<compile_context>
chip_gen: v6e
topology: v6e:2x2x1
jax: 0.10.0
libtpu: 0.0.40
codegen_flags: <defaults>
</compile_context>

<pallas_src>
import functools

import jax
import jax.numpy as jnp
from jax.experimental import pallas as pl
from jax.experimental.pallas import tpu as pltpu


def _round_up(x, m):
    return ((x + m - 1) // m) * m


# ---------------------------------------------------------------------------
# Kernel: whole eval-mode MLP forward for one tile of rows.
# refs = (w_0, b_0, w_1, b_1, ..., o_ref); BN already folded into W/b.
# ---------------------------------------------------------------------------
def _grand_plus_kernel(x_ref, *refs, node_norm):
    o_ref = refs[-1]
    wb_refs = refs[:-1]
    num_layers = len(wb_refs) // 2

    h = x_ref[...]                                   # f32 (tile_n, hidden)
    for l in range(num_layers):                      # static Python loop: straight-line body
        w = wb_refs[2 * l][...]                      # (d_in, d_out) resident in VMEM
        b = wb_refs[2 * l + 1][...]                  # (1, d_out)
        h = jnp.maximum(h, 0.0)                      # F.relu
        if node_norm:
            nrm = jnp.sqrt(jnp.sum(h * h, axis=-1, keepdims=True))
            h = h * pl.reciprocal(1e-12 + nrm, approx=True)   # divide on the EUP slot
        # dropout(training=False) == identity
        h = jnp.dot(h, w, preferred_element_type=jnp.float32) + b
    o_ref[...] = h


# ---------------------------------------------------------------------------
# Parameter preparation (done ONCE, outside the per-forward path).
# ---------------------------------------------------------------------------
def init_grand_plus_params(key, num_features, num_classes, hidden_size, nlayers):
    """Deterministic synthetic parameters (shapes match the PyTorch module)."""
    assert nlayers >= 2, "this script implements the nlayers > 1 branch"
    dims = [hidden_size] * (nlayers - 1) + [num_classes]
    params = []
    for i in range(nlayers - 1):
        d_in, d_out = dims[i], dims[i + 1]
        key, kw, kb = jax.random.split(key, 3)
        bound = 1.0 / jnp.sqrt(d_in)
        w = jax.random.uniform(kw, (d_out, d_in), jnp.float32, -bound, bound)
        b = jax.random.uniform(kb, (d_out,), jnp.float32, -bound, bound)
        # BatchNorm1d default init / fresh running stats.
        params.append(dict(w=w, b=b,
                           gamma=jnp.ones((d_in,), jnp.float32),
                           beta=jnp.zeros((d_in,), jnp.float32),
                           mean=jnp.zeros((d_in,), jnp.float32),
                           var=jnp.ones((d_in,), jnp.float32)))
    return params


def fold_params(params, *, use_bn=True, eps=1e-5):
    """Fold eval-mode BN into the following Linear and pre-transpose.
    No lane padding: the last layer keeps its true num_classes output dim."""
    folded = []
    for p in params:
        w_t = p["w"].T.astype(jnp.float32)               # (d_in, d_out)
        if use_bn:
            a = p["gamma"] * jax.lax.rsqrt(p["var"] + eps)
            w_f = w_t * a[:, None]
            b_f = (p["beta"] - p["mean"] * a) @ w_t + p["b"]
        else:
            w_f, b_f = w_t, p["b"]
        folded.append((w_f.astype(jnp.float32), b_f[None, :].astype(jnp.float32)))
    return folded


def _choose_tile_n(n, tile_n, min_blocks=2):
    """Sublane-aligned row tile; keep >=2 grid blocks when possible so the
    'parallel' node axis actually spreads over both TCs on v7x."""
    tile_n = max(8, _round_up(min(tile_n, n), 8))
    if n > 8 * min_blocks:
        tile_n = min(tile_n, _round_up(pl.cdiv(n, min_blocks), 8))
    return tile_n


# ---------------------------------------------------------------------------
# Forward: single pallas_call, grid over node tiles, weights VMEM-resident.
# ---------------------------------------------------------------------------
@functools.partial(jax.jit, static_argnames=("tile_n", "node_norm"))
def grand_plus_forward(X, folded, *, tile_n=1024, node_norm=False):
    n, feat = X.shape
    out_dim = folded[-1][0].shape[1]                 # true num_classes (no padding)
    tn = _choose_tile_n(n, tile_n)
    grid = (pl.cdiv(n, tn),)                         # ragged last block is masked by Pallas

    in_specs = [pl.BlockSpec((tn, feat), lambda i: (i, 0))]
    flat_args = [X]
    for w, b in folded:
        in_specs.append(pl.BlockSpec(w.shape, lambda i: (0, 0)))   # resident, full block
        in_specs.append(pl.BlockSpec(b.shape, lambda i: (0, 0)))
        flat_args += [w, b]

    # VMEM budget guard: X/out tiles and weights are double-buffered by default.
    elt = 4
    vmem_est = 2 * elt * (tn * feat + tn * out_dim)
    vmem_est += 2 * elt * sum(int(w.size) + int(b.size) for w, b in folded)
    vmem_limit = int(min(max(vmem_est + (4 << 20), 32 << 20), 64 << 20))

    kernel = functools.partial(_grand_plus_kernel, node_norm=node_norm)
    return pl.pallas_call(
        kernel,
        out_shape=jax.ShapeDtypeStruct((n, out_dim), jnp.float32),
        grid=grid,
        in_specs=in_specs,
        out_specs=pl.BlockSpec((tn, out_dim), lambda i: (i, 0)),
        compiler_params=pltpu.CompilerParams(
            dimension_semantics=("parallel",),
            vmem_limit_bytes=vmem_limit),
    )(*flat_args)


# ---------------------------------------------------------------------------
# Pure-JAX reference (unfolded BN) for correctness check.
# ---------------------------------------------------------------------------
def _reference_forward(X, params, *, use_bn=True, node_norm=False):
    embs = X
    for p in params:
        h = jnp.maximum(embs, 0.0)
        if node_norm:
            h = h / (1e-12 + jnp.linalg.norm(h, axis=-1, keepdims=True))
        if use_bn:
            h = (h - p["mean"]) / jnp.sqrt(p["var"] + 1e-5) * p["gamma"] + p["beta"]
        embs = h @ p["w"].T + p["b"]
    return embs


if __name__ == "__main__":
    # Small config consistent with the module: nlayers=3 => 2 Linear layers.
    num_features = 100      # only used by Embedding in MLP.emb (not in forward)
    num_classes = 8
    hidden_size = 32
    nlayers = 3
    n_nodes = 100           # non-multiple of the tile: exercises multi-block grid + ragged block

    key = jax.random.PRNGKey(0)
    key, kx = jax.random.split(key)
    # forward(X) consumes already-embedded node features: (N, hidden_size)
    X = jax.random.normal(kx, (n_nodes, hidden_size), jnp.float32)

    params = init_grand_plus_params(key, num_features, num_classes,
                                    hidden_size, nlayers)
    folded = fold_params(params, use_bn=True)        # BN folded once, offline

    logits = grand_plus_forward(X, folded, tile_n=1024, node_norm=False)
    logits = jax.block_until_ready(logits)

    ref = _reference_forward(X, params, use_bn=True, node_norm=False)
    assert logits.shape == (n_nodes, num_classes)
    assert jnp.allclose(logits, ref, atol=1e-4, rtol=1e-4), "mismatch vs reference"

    # TODO(synk): scatter-based MLP.emb()/random_prop() (segment-sum over sparse
    # attr/node indices) are not part of forward(X); not implemented here.
    print("KERNEL_OK")
</pallas_src>

<mosaic_0001>
module attributes {stable_mosaic.version = 11 : i64} {
  func.func @_grand_plus_kernel(%arg0: i32, %arg1: memref<56x32xf32, #tpu.memory_space<vmem>>, %arg2: memref<32x32xf32, #tpu.memory_space<vmem>>, %arg3: memref<1x32xf32, #tpu.memory_space<vmem>>, %arg4: memref<32x8xf32, #tpu.memory_space<vmem>>, %arg5: memref<1x8xf32, #tpu.memory_space<vmem>>, %arg6: memref<56x8xf32, #tpu.memory_space<vmem>>) attributes {dimension_semantics = [#tpu.dimension_semantics<parallel>], iteration_bounds = array<i64: 2>, scalar_prefetch = 0 : i64, scratch_operands = 0 : i64, tpu.core_type = #tpu.core_type<tc>, window_params = [{transform_indices = @transform_0, window_bounds = array<i64: 56, 32>}, {pipeline_mode = #tpu.pipeline_mode<synchronous>, transform_indices = @transform_1, window_bounds = array<i64: 32, 32>}, {pipeline_mode = #tpu.pipeline_mode<synchronous>, transform_indices = @transform_2, window_bounds = array<i64: 1, 32>}, {pipeline_mode = #tpu.pipeline_mode<synchronous>, transform_indices = @transform_3, window_bounds = array<i64: 32, 8>}, {pipeline_mode = #tpu.pipeline_mode<synchronous>, transform_indices = @transform_4, window_bounds = array<i64: 1, 8>}, {transform_indices = @transform_5, window_bounds = array<i64: 56, 8>}]} {
    %c0 = arith.constant 0 : index
    %c0_0 = arith.constant 0 : index
    %0 = vector.load %arg1[%c0, %c0_0] : memref<56x32xf32, #tpu.memory_space<vmem>>, vector<56x32xf32>
    %c0_1 = arith.constant 0 : index
    %c0_2 = arith.constant 0 : index
    %1 = vector.load %arg2[%c0_1, %c0_2] : memref<32x32xf32, #tpu.memory_space<vmem>>, vector<32x32xf32>
    %c0_3 = arith.constant 0 : index
    %c0_4 = arith.constant 0 : index
    %2 = vector.load %arg3[%c0_3, %c0_4] : memref<1x32xf32, #tpu.memory_space<vmem>>, vector<1x32xf32>
    %cst = arith.constant 0.000000e+00 : f32
    %3 = vector.broadcast %cst : f32 to vector<56x32xf32>
    %4 = arith.maximumf %0, %3 : vector<56x32xf32>
    %cst_5 = arith.constant dense<0.000000e+00> : vector<56x32xf32>
    %5 = tpu.matmul %4, %1, %cst_5 {dimension_numbers = #tpu.dot_dimension_numbers<[1], [0], [0], [1], [0, 0, 1, 1], [], []>} : vector<56x32xf32>, vector<32x32xf32>, vector<56x32xf32> -> vector<56x32xf32>
    %6 = vector.broadcast %2 : vector<1x32xf32> to vector<56x32xf32>
    %7 = arith.addf %5, %6 : vector<56x32xf32>
    %c0_6 = arith.constant 0 : index
    %c0_7 = arith.constant 0 : index
    %8 = vector.load %arg4[%c0_6, %c0_7] : memref<32x8xf32, #tpu.memory_space<vmem>>, vector<32x8xf32>
    %c0_8 = arith.constant 0 : index
    %c0_9 = arith.constant 0 : index
    %9 = vector.load %arg5[%c0_8, %c0_9] : memref<1x8xf32, #tpu.memory_space<vmem>>, vector<1x8xf32>
    %cst_10 = arith.constant 0.000000e+00 : f32
    %10 = vector.broadcast %cst_10 : f32 to vector<56x32xf32>
    %11 = arith.maximumf %7, %10 : vector<56x32xf32>
    %cst_11 = arith.constant dense<0.000000e+00> : vector<56x8xf32>
    %12 = tpu.matmul %11, %8, %cst_11 {dimension_numbers = #tpu.dot_dimension_numbers<[1], [0], [0], [1], [0, 0, 1, 1], [], []>} : vector<56x32xf32>, vector<32x8xf32>, vector<56x8xf32> -> vector<56x8xf32>
    %13 = vector.broadcast %9 : vector<1x8xf32> to vector<56x8xf32>
    %14 = arith.addf %12, %13 : vector<56x8xf32>
    %c0_12 = arith.constant 0 : index
    %c0_13 = arith.constant 0 : index
    %15 = vector.load %arg6[%c0_12, %c0_13] : memref<56x8xf32, #tpu.memory_space<vmem>>, vector<56x8xf32>
    tpu.vector_store %arg6[%c0_12, %c0_13], %14 {strides = array<i32>} : memref<56x8xf32, #tpu.memory_space<vmem>>, vector<56x8xf32>,
    return
  }
  func.func @transform_0(%arg0: i32) -> (i32, i32) {
    %c0_i32 = arith.constant 0 : i32
    %c0_i32_0 = arith.constant 0 : i32
    return %arg0, %c0_i32 : i32, i32
  }
  func.func @transform_1(%arg0: i32) -> (i32, i32) {
    %c0_i32 = arith.constant 0 : i32
    %c0_i32_0 = arith.constant 0 : i32
    %c0_i32_1 = arith.constant 0 : i32
    return %c0_i32, %c0_i32_0 : i32, i32
  }
  func.func @transform_2(%arg0: i32) -> (i32, i32) {
    %c0_i32 = arith.constant 0 : i32
    %c0_i32_0 = arith.constant 0 : i32
    %c0_i32_1 = arith.constant 0 : i32
    return %c0_i32, %c0_i32_0 : i32, i32
  }
  func.func @transform_3(%arg0: i32) -> (i32, i32) {
    %c0_i32 = arith.constant 0 : i32
    %c0_i32_0 = arith.constant 0 : i32
    %c0_i32_1 = arith.constant 0 : i32
    return %c0_i32, %c0_i32_0 : i32, i32
  }
  func.func @transform_4(%arg0: i32) -> (i32, i32) {
    %c0_i32 = arith.constant 0 : i32
    %c0_i32_0 = arith.constant 0 : i32
    %c0_i32_1 = arith.constant 0 : i32
    return %c0_i32, %c0_i32_0 : i32, i32
  }
  func.func @transform_5(%arg0: i32) -> (i32, i32) {
    %c0_i32 = arith.constant 0 : i32
    %c0_i32_0 = arith.constant 0 : i32
    return %arg0, %c0_i32 : i32, i32
  }
}

</mosaic_0001>

<bundles_post_ra>
// kernel: grand_plus_forward.1
= control target key start
LH: loop header
LB: loop body
LE: loop exit
PB: predicated region body
PF: predicated region fallthrough
CT: control target
= control target key end

     0   :  { %s1112_s18 = smov 0   ;;  %s1114_s19 = smov 0   ;;  %s1302_s0 = inlined_call_operand.vmem [shape: f32[100,32], index: 0, kind: input, shape index: {}]   ;;  %s1303_s1 = inlined_call_operand.vmem [shape: f32[32,32], index: 1, kind: input, shape index: {}]   ;;  %s1304_s2 = inlined_call_operand.vmem [shape: f32[1,32], index: 2, kind: input, shape index: {}]   ;;  %s1305_s3 = inlined_call_operand.vmem [shape: f32[32,8], index: 3, kind: input, shape index: {}]   ;;  %s1306_s4 = inlined_call_operand.vmem [shape: f32[1,8], index: 4, kind: input, shape index: {}]   ;;  %s1307_s5 = inlined_call_operand.vmem [shape: f32[100,8], index: 5, kind: output, shape index: {}]  }
   0x1   :  { %s1116_s20 = smov 0  }
   0x2 LB: > { %s1125_s21 = sadd.s32 4294967295, %s1046_s20   ;;  %s1127_s22 = sadd.s32 1, %s1046_s20   ;;  %s1046_s20 = sphi %s1116_s20, %s1314_s20   ;;  %s1042_s19 = sphi %s1114_s19, %s1313_s19   ;;  %s1038_s18 = sphi %s1112_s18, %s1312_s18  }
   0x3   : > { %s129_s23 = ssub.s32 %s1046_s20, %s1127_s22  ;;  %s132_s24 = sadd.s32 1, %s1042_s19 }
   0x4   : > { %p130_p0 = scmp.eq.s32.totalorder %s129_s23, 0  ;;  %p142_p1 = scmp.ne.s32.totalorder %s1042_s19, %s1038_s18 }
   0x5   : > { %p143_p2 = scmp.eq.s32.totalorder %s1125_s21, 1  ;;  %p785_p3 = scmp.ge.s32.totalorder %s1046_s20, 1 }
   0x6   : > { %s1135_s25 = scalar_select %p130_p0, %s1042_s19, %s132_s24  }
   0x7   : > { %p1137_p4 = por %p143_p2, %p142_p1  ;;  %p196_p5 = scmp.lt.s32.totalorder %s1046_s20, 3 }
   0x9   : > { %p197_p6 = pnand %p785_p3, %p196_p5 }
   0xa   : > { %s1145_s29 = smul.u32 (!%p197_p6), 7, %s1125_s21  ;;  %s224_s8 = sand.u32 (!%p197_p6), 1, %s1038_s18  }
   0xb   : > { %200 = sbr.rel (%p197_p6) target bundleno = 495 (0x1ef), region = 40 }
   0xc   : > { %p232_p7 = scmp.lt.s32.totalorder (!%p197_p6), %s1145_s29, 12  ;;  %s896_s9 = smul.u32 (!%p197_p6), 56, %s224_s8 }
   0xe   : > { %s1230_s12 = scalar_lea.vmem (!%p197_p6), [#allocation2], %s896_s9  }
  0x10   : > { %v256_v0 = vld [vmem:[%s1303_s1 + $0x18] sm:$0xff]  ;;  %v1080_v1 = vmov 0.0   ;;  %v255_v2 = vld [vmem:[%s1303_s1 + $0x10] sm:$0xff]  ;;  %vm1081_vm0 = vmmov 0   ;;  %v254_v4 = vld [vmem:[%s1303_s1 + $0x8] sm:$0xff]  ;;  %s233_s11 = scalar_select %p232_p7, %s1145_s29, 12 }
  0x11   : > { %838 = vmatprep.subr.mxu0 %v1080_v1  ;;  %846 = vmatprep.mubr.msk.f32.mxu0 %vm1081_vm0, %v1080_v1  ;;  %v396_v3 = vld [vmem:[%s1305_s3 + $0x18] sm:$0xff]  ;;  %v253_v5 = vld [vmem:[%s1303_s1] sm:$0xff]  ;;  %vm271_vm1 = vcmask 261120   ;;  %v395_v20 = vld [vmem:[%s1305_s3 + $0x10] sm:$0xff]  ;;  %vm532_vm2 = vcmask 64512   ;;  %s548_s18 = ssub.s32 (%p1137_p4), 13, %s1145_s29 }
  0x12   : > { %839 = vmatpush3.msra.mxu0 %v256_v0  ;;  %867 = vmatprep.subr.mxu1 %v1080_v1  ;;  %s786_s14 = sshll.u32 %s233_s11, 3  ;;  %v394_v21 = vld [vmem:[%s1305_s3 + $0x8] sm:$0xff]  ;;  %v393_v22 = vld [vmem:[%s1305_s3] sm:$0xff]  ;;  %s815_s13 = smul.u32 (%p1137_p4), 56, %s1125_s21 }
  0x13   : > { %840 = vmatprep.subr.mxu0 %v1080_v1  ;;  %868 = vmatpush3.msra.mxu1 %v396_v3  ;;  %s235_s17 = scalar_lea.vmem %s1302_s0, %s786_s14  ;;  %v787_v23 = vld [vmem:[%s1304_s2] ss:$0 sm:$0xff]  ;;  %p549_p8 = scmp.lt.s32.totalorder (%p1137_p4), %s548_s18, 7 }
  0x14   : > { %841 = vmatpush3.msra.mxu0 %v255_v2  ;;  %869 = vmatprep.subr.mxu1 %v1080_v1  ;;  %v246_v6 = vld [vmem:[%s235_s17] sm:$0xff]  ;;  %v247_v7 = vld [vmem:[%s235_s17 + $0x8] sm:$0xff]  ;;  %v248_v10 = vld [vmem:[%s235_s17 + $0x10] sm:$0xff]  ;;  %s1253_s16 = scalar_lea.vmem (%p1137_p4), %s1307_s5, %s815_s13  }
  0x15   : > { %842 = vmatprep.subr.mxu0 %v1080_v1  ;;  %875 = vmatprep.mubr.msk.f32.mxu1 %vm1081_vm0, %v1080_v1  ;;  %v258_v8 = vmax.f32 %v246_v6, 0.0  ;;  %v259_v9 = vmax.f32 %v247_v7, 0.0  ;;  %v260_v11 = vmax.f32 %v248_v10, 0.0  ;;  %v249_v12 = vld [vmem:[%s235_s17 + $0x18] sm:$0xff]  ;;  %v250_v14 = vld [vmem:[%s235_s17 + $0x20] sm:$0xff]  ;;  %v251_v16 = vld [vmem:[%s235_s17 + $0x28] sm:$0xff] }
  0x16   : > { %843 = vmatpush3.msra.mxu0 %v254_v4  ;;  %v261_v13 = vmax.f32 %v249_v12, 0.0  ;;  %v262_v15 = vmax.f32 %v250_v14, 0.0  ;;  %v263_v17 = vmax.f32 %v251_v16, 0.0  ;;  %v252_v18 = vld [vmem:[%s235_s17 + $0x30] sm:$0xff]  ;;  %870 = vmatpush3.msra.mxu1 %v395_v20  ;;  %v795_v52 = vld [vmem:[%s1306_s4] ss:$0 sm:$0xff] }
  0x17   : > { %844 = vmatprep.subr.mxu0 %v1080_v1  ;;  %v264_v19 = vmax.f32 %v252_v18, 0.0  ;;  %871 = vmatprep.subr.mxu1 %v1080_v1 }
  0x18   : > { %845 = vmatpush3.msra.mxu0 %v253_v5  ;;  %872 = vmatpush3.msra.mxu1 %v394_v21 }
  0x19   : > { %847 = vmatmul.mubr.msk.f32.vlgmr.msra.gmra.mxu0 %vm271_vm1, %v258_v8  ;;  %873 = vmatprep.subr.mxu1 %v1080_v1 }
  0x1a   : > { %849 = vmatprep.mubr.msk.f32.mxu0 %vm1081_vm0, %v1080_v1  ;;  %874 = vmatpush3.msra.mxu1 %v393_v22 }
  0x1d   : > { %850 = vmatmul.mubr.msk.f32.gmra.mxu0 %vm271_vm1, %v259_v9 }
  0x1e   : > { %852 = vmatprep.mubr.msk.f32.mxu0 %vm1081_vm0, %v1080_v1 }
  0x21   : > { %853 = vmatmul.mubr.msk.f32.gmra.mxu0 %vm271_vm1, %v260_v11 }
  0x22   : > { %855 = vmatprep.mubr.msk.f32.mxu0 %vm1081_vm0, %v1080_v1 }
  0x25   : > { %856 = vmatmul.mubr.msk.f32.gmra.mxu0 %vm271_vm1, %v261_v13 }
  0x26   : > { %858 = vmatprep.mubr.msk.f32.mxu0 %vm1081_vm0, %v1080_v1 }
  0x29   : > { %859 = vmatmul.mubr.msk.f32.gmra.mxu0 %vm271_vm1, %v262_v15 }
  0x2a   : > { %861 = vmatprep.mubr.msk.f32.mxu0 %vm1081_vm0, %v1080_v1 }
  0x2d   : > { %862 = vmatmul.mubr.msk.f32.gmra.mxu0 %vm271_vm1, %v263_v17 }
  0x2e   : > { %864 = vmatprep.mubr.msk.f32.mxu0 %vm1081_vm0, %v1080_v1 }
  0x31   : > { %865 = vmatmul.mubr.msk.f32.gmra.mxu0 %vm271_vm1, %v264_v19 }
  0xd9   : > { %v359_v24 = vpop.f32.mrf.mxu0 }
  0xda   : > { %v360_v25 = vadd.f32 %v787_v23, %v359_v24 }
  0xdb   : > { %v848_v26 = vpop.f32.mrf.mxu0 }
  0xdc   : > { %v398_v27 = vmax.f32 %v360_v25, 0.0 }
  0xdd   : > { %v364_v28 = vpop.f32.mrf.mxu0 }
  0xde   : > { %v365_v29 = vadd.f32 %v787_v23, %v364_v28  ;;  %876 = vmatmul.mubr.msk.f32.vlgmr.msra.gmra.mxu1 %vm271_vm1, %v398_v27 }
  0xdf   : > { %v851_v30 = vpop.f32.mrf.mxu0  ;;  %878 = vmatprep.mubr.msk.f32.mxu1 %vm1081_vm0, %v1080_v1 }
  0xe0   : > { %v399_v31 = vmax.f32 %v365_v29, 0.0 }
  0xe1   : > { %v369_v32 = vpop.f32.mrf.mxu0 }
  0xe2   : > { %v370_v33 = vadd.f32 %v787_v23, %v369_v32  ;;  %879 = vmatmul.mubr.msk.f32.gmra.mxu1 %vm271_vm1, %v399_v31 }
  0xe3   : > { %v854_v34 = vpop.f32.mrf.mxu0  ;;  %881 = vmatprep.mubr.msk.f32.mxu1 %vm1081_vm0, %v1080_v1 }
  0xe4   : > { %v400_v35 = vmax.f32 %v370_v33, 0.0 }
  0xe5   : > { %v374_v36 = vpop.f32.mrf.mxu0 }
  0xe6   : > { %v375_v37 = vadd.f32 %v787_v23, %v374_v36  ;;  %882 = vmatmul.mubr.msk.f32.gmra.mxu1 %vm271_vm1, %v400_v35 }
  0xe7   : > { %v857_v38 = vpop.f32.mrf.mxu0  ;;  %884 = vmatprep.mubr.msk.f32.mxu1 %vm1081_vm0, %v1080_v1 }
  0xe8   : > { %v401_v39 = vmax.f32 %v375_v37, 0.0 }
  0xe9   : > { %v379_v40 = vpop.f32.mrf.mxu0 }
  0xea   : > { %v380_v41 = vadd.f32 %v787_v23, %v379_v40  ;;  %885 = vmatmul.mubr.msk.f32.gmra.mxu1 %vm271_vm1, %v401_v39 }
  0xeb   : > { %v860_v42 = vpop.f32.mrf.mxu0  ;;  %887 = vmatprep.mubr.msk.f32.mxu1 %vm1081_vm0, %v1080_v1 }
  0xec   : > { %v402_v43 = vmax.f32 %v380_v41, 0.0 }
  0xed   : > { %v384_v44 = vpop.f32.mrf.mxu0 }
  0xee   : > { %v385_v45 = vadd.f32 %v787_v23, %v384_v44  ;;  %888 = vmatmul.mubr.msk.f32.gmra.mxu1 %vm271_vm1, %v402_v43 }
  0xef   : > { %v863_v46 = vpop.f32.mrf.mxu0  ;;  %890 = vmatprep.mubr.msk.f32.mxu1 %vm1081_vm0, %v1080_v1 }
  0xf0   : > { %v403_v47 = vmax.f32 %v385_v45, 0.0 }
  0xf1   : > { %v389_v48 = vpop.f32.mrf.mxu0 }
  0xf2   : > { %v390_v49 = vadd.f32 %v787_v23, %v389_v48  ;;  %891 = vmatmul.mubr.msk.f32.gmra.mxu1 %vm271_vm1, %v403_v47 }
  0xf3   : > { %v866_v50 = vpop.f32.mrf.mxu0  ;;  %893 = vmatprep.mubr.msk.f32.mxu1 %vm1081_vm0, %v1080_v1 }
  0xf4   : > { %v404_v51 = vmax.f32 %v390_v49, 0.0 }
  0xf6   : > { %894 = vmatmul.mubr.msk.f32.gmra.mxu1 %vm271_vm1, %v404_v51 }
 0x19e   : > { %v498_v53 = vpop.f32.mrf.mxu1 }
 0x19f   : > { %v499_v54 = vadd.f32 %v795_v52, %v498_v53 }
 0x1a0   : > { %v877_v55 = vpop.f32.mrf.mxu1 }
 0x1a1   : > { %533 = vst.msk [vmem:[%s1230_s12] sm:$0xff] %vm532_vm2, %v499_v54 }
 0x1a2   : > { %v503_v56 = vpop.f32.mrf.mxu1 }
 0x1a3   : > { %v504_v57 = vadd.f32 %v795_v52, %v503_v56 }
 0x1a4   : > { %v880_v58 = vpop.f32.mrf.mxu1 }
 0x1a5   : > { %534 = vst.msk [vmem:[%s1230_s12 + $0x8] sm:$0xff] %vm532_vm2, %v504_v57 }
 0x1a6   : > { %v508_v59 = vpop.f32.mrf.mxu1 }
 0x1a7   : > { %v509_v60 = vadd.f32 %v795_v52, %v508_v59 }
 0x1a8   : > { %v883_v61 = vpop.f32.mrf.mxu1 }
 0x1a9   : > { %535 = vst.msk [vmem:[%s1230_s12 + $0x10] sm:$0xff] %vm532_vm2, %v509_v60 }
 0x1aa   : > { %v513_v62 = vpop.f32.mrf.mxu1 }
 0x1ab   : > { %v514_v63 = vadd.f32 %v795_v52, %v513_v62 }
 0x1ac   : > { %v886_v0 = vpop.f32.mrf.mxu1 }
 0x1ad   : > { %536 = vst.msk [vmem:[%s1230_s12 + $0x18] sm:$0xff] %vm532_vm2, %v514_v63 }
 0x1ae   : > { %v518_v1 = vpop.f32.mrf.mxu1 }
 0x1af   : > { %v519_v2 = vadd.f32 %v795_v52, %v518_v1 }
 0x1b0   : > { %v889_v3 = vpop.f32.mrf.mxu1 }
 0x1b1   : > { %537 = vst.msk [vmem:[%s1230_s12 + $0x20] sm:$0xff] %vm532_vm2, %v519_v2 }
 0x1b2   : > { %v523_v4 = vpop.f32.mrf.mxu1 }
 0x1b3   : > { %v524_v5 = vadd.f32 %v795_v52, %v523_v4 }
 0x1b4   : > { %v892_v6 = vpop.f32.mrf.mxu1 }
 0x1b5   : > { %538 = vst.msk [vmem:[%s1230_s12 + $0x28] sm:$0xff] %vm532_vm2, %v524_v5  ;;  %546 = sbr.rel (!%p1137_p4) target bundleno = 495 (0x1ef), region = 44 }
 0x1b6   : > { %v528_v7 = vpop.f32.mrf.mxu1 }
 0x1b7   : > { %v529_v8 = vadd.f32 %v795_v52, %v528_v7 }
 0x1b8   : > { %v895_v9 = vpop.f32.mrf.mxu1 }
 0x1b9   : > { %539 = vst.msk [vmem:[%s1230_s12 + $0x30] sm:$0xff] %vm532_vm2, %v529_v8 }
 0x1ba   : > { %s1316_s18 = smov (!%p549_p8, %s548_s18), 7 }
 0x1bb   : > { %s803_s17 = sshll.u32 %s1316_s18, 7 }
 0x1bc   : > { %p806_p9 = scmp.eq.s32.totalorder %s803_s17, 0 }
 0x1bd   : > { %988 = sdivrem.u32 (!%p806_p9), %s1316_s18, 7 }
 0x1be   : > { %557 = sbr.rel (%p806_p9) target bundleno = 495 (0x1ef), region = 48 }
 0x1c6   : > { %s1259_s26 = spop.drf %988 }
 0x1c7   : > { %p807_p10 = scmp.le.s32.totalorder %s1259_s26, 0 }
 0x1c8   : > { %s1309_s21 = smov (!%p807_p10), %s1253_s16  ;;  %s1310_s29 = smov (!%p807_p10), %s1230_s12 }
 0x1c9   : > { %738 = sbr.rel (%p807_p10) target bundleno = 470 (0x1d6), region = 124  ;;  %s1268_s20 = smov (!%p807_p10), 0  }
 0x1ca   : > { %s1270_s23 = smov (!%p807_p10), 0  }
 0x1ce LB: >> { %v634_v10 = vld [vmem:[%s1054_s29] sm:$0xff]  ;;  %v636_v11 = vld [vmem:[%s1054_s29 + $0x8] sm:$0xff]  ;;  %v638_v12 = vld [vmem:[%s1054_s29 + $0x10] sm:$0xff]  ;;  %s648_s24 = sadd.s32 1, %s1058_s20  ;;  %s628_s23 = sadd.s32 1, %s1062_s23   ;;  %s1062_s23 = sphi %s1270_s23, %s628_s23   ;;  %s1058_s20 = sphi %s1268_s20, %s1311_s20   ;;  %s1054_s29 = sphi %s1310_s29, %s653_s29   ;;  %s1050_s21 = sphi %s1309_s21, %s654_s21  }
 0x1cf   : >> { %635 = vst [vmem:[%s1050_s21] sm:$0xff] %v634_v10  ;;  %637 = vst [vmem:[%s1050_s21 + $0x8] sm:$0xff] %v636_v11  ;;  %v640_v13 = vld [vmem:[%s1054_s29 + $0x18] sm:$0xff]  ;;  %v642_v14 = vld [vmem:[%s1054_s29 + $0x20] sm:$0xff]  ;;  %p649_p11 = scmp.ge.s32.totalorder %s648_s24, %s1259_s26  ;;  %p627_p12 = scmp.ge.s32.totalorder %s628_s23, %s1259_s26 }
 0x1d0   : >> { %639 = vst [vmem:[%s1050_s21 + $0x10] sm:$0xff] %v638_v12  ;;  %v644_v15 = vld [vmem:[%s1054_s29 + $0x28] sm:$0xff]  ;;  %641 = vst [vmem:[%s1050_s21 + $0x18] sm:$0xff] %v640_v13  ;;  %v646_v16 = vld [vmem:[%s1054_s29 + $0x30] sm:$0xff] }
 0x1d1   : >> { %643 = vst [vmem:[%s1050_s21 + $0x20] sm:$0xff] %v642_v14  ;;  %645 = vst [vmem:[%s1050_s21 + $0x28] sm:$0xff] %v644_v15  ;;  %s1318_s24 = smov (%p649_p11, %s648_s24), 0  ;;  %630 = sbr.rel (!%p627_p12) target bundleno = 462 (0x1ce), region = 130 }
 0x1d2   : >> { %647 = vst [vmem:[%s1050_s21 + $0x30] sm:$0xff] %v646_v16  ;;  %s651_s27 = smul.u32 56, %s1318_s24  ;;  %s1311_s20 = smov %s1318_s24 }
 0x1d4   : >> { %s653_s29 = scalar_lea.vmem %s1230_s12, %s651_s27 [#allocation2]   ;;  %s654_s21 = scalar_lea.vmem %s1253_s16, %s651_s27  }
 0x1d6 PF: > { %990 = sdivrem.u32 %s1316_s18, 7 }
 0x1d7   : > { %s808_s28 = smul.u32 56, %s1259_s26 }
 0x1d9   : > { %s659_s30 = scalar_lea.vmem %s1230_s12, %s808_s28 [#allocation2]   ;;  %s661_s6 = scalar_lea.vmem %s1253_s16, %s808_s28  }
 0x1df   : > { %s991_s7 = spop.drf %990 }
 0x1e0   : > { %p810_p13 = scmp.le.s32.totalorder %s991_s7, 0 }
 0x1e1   : > { %s1064_s8 = smov (!%p810_p13), %s661_s6   ;;  %s1068_s9 = smov (!%p810_p13), %s659_s30  }
 0x1e2   : > { %752 = sbr.rel (%p810_p13) target bundleno = 495 (0x1ef), region = 135  ;;  %s1072_s10 = smov (!%p810_p13), 0  }
 0x1e3   : > { %s1076_s11 = smov (!%p810_p13), 0  }
 0x1e7 LB: >> { %v671_v17 = vld [vmem:[%s1070_s9] sm:$0xff]  ;;  %s673_s13 = sadd.s32 1, %s1074_s10  ;;  %s665_s11 = sadd.s32 1, %s1078_s11   ;;  %s1078_s11 = sphi %s1076_s11, %s665_s11   ;;  %s1074_s10 = sphi %s1072_s10, %s1073_s10   ;;  %s1070_s9 = sphi %s1068_s9, %s678_s9   ;;  %s1066_s8 = sphi %s1064_s8, %s679_s8  }
 0x1e8   : >> { %672 = vst [vmem:[%s1066_s8] sm:$0xff] %v671_v17  ;;  %p674_p0 = scmp.ge.s32.totalorder %s673_s13, %s991_s7  ;;  %p664_p1 = scmp.ge.s32.totalorder %s665_s11, %s991_s7 }
 0x1ea   : >> { %s1320_s13 = smov (%p674_p0, %s673_s13), 0  ;;  %667 = sbr.rel (!%p664_p1) target bundleno = 487 (0x1e7), region = 141 }
 0x1eb   : >> { %s811_s12 = sshll.u32 %s1320_s13, 3  ;;  %s1073_s10 = smov %s1320_s13  }
 0x1ec   : >> { %s678_s9 = scalar_lea.vmem %s659_s30, %s811_s12 [#allocation2]   ;;  %s679_s8 = scalar_lea.vmem %s661_s6, %s811_s12  }
 0x1ef PF: > { %p12_p2 = scmp.ge.s32.totalorder %s1127_s22, 4   ;;  %s1312_s18 = smov %s1042_s19 }
 0x1f0   : > { %s1313_s19 = smov %s1135_s25  ;;  %s1314_s20 = smov %s1127_s22 }
 0x1f1   :  { %14 = sbr.rel (!%p12_p2) target bundleno = 2 (0x2), region = 152 }

</bundles_post_ra>
